<compile_context>
chip_gen: v7x
topology: tpu7x:2x2x1
jax: 0.10.0
libtpu: 0.0.40
codegen_flags: <defaults>
</compile_context>

<pallas_src>
import random

import jax
import jax.numpy as jnp
import numpy as np
from jax import lax
from jax.experimental import pallas as pl
from jax.experimental.pallas import tpu as pltpu


def _time_swap_kernel(scal_ref, x_ref, y_ref):
    size = scal_ref[0]
    from_idx = scal_ref[1]
    to_idx = scal_ref[2]

    x = x_ref[...]
    tt = x.shape[-1]  # (padded) time width, static at trace time

    col = lax.broadcasted_iota(jnp.int32, x.shape, 1)  # destination column j
    in_from = (col >= from_idx) & (col < from_idx + size)
    in_to = (col >= to_idx) & (col < to_idx + size)

    d = to_idx - from_idx  # signed column offset (to - from), |d| < tt
    # pltpu.roll follows np.roll semantics: roll(x, s)[:, j] = x[:, (j - s) % tt].
    # Shifts are kept non-negative.
    shift_from = jnp.where(d > 0, tt - d, -d)  # == (-d) mod tt -> view[:, j] = x[:, j + d]
    shift_to = jnp.where(d < 0, tt + d, d)     # ==   d mod tt  -> view[:, j] = x[:, j - d]
    from_view = pltpu.roll(x, shift_from, 1)   # feeds the `from` segment
    to_view = pltpu.roll(x, shift_to, 1)       # feeds the `to` segment

    # Reference writes the `from` slice first and the `to` slice second, so the
    # `to` region wins where the two segments overlap.
    y_ref[...] = jnp.where(in_to, to_view, jnp.where(in_from, from_view, x))


def time_swap(x, size, from_index, to_index, *, row_tile=None):
    """Swap x[:, from:from+size] and x[:, to:to+size] (to-segment wins on overlap)."""
    n, t = x.shape

    # Keep the time axis lane-dense (multiple of 128) so stores are unmasked.
    t_pad = ((t + 127) // 128) * 128
    xp = x if t_pad == t else jnp.pad(x, ((0, 0), (0, t_pad - t)))

    itemsize = xp.dtype.itemsize
    if row_tile is None:
        # ~2 MiB input block: (in + out) x double-buffering ~= 8 MiB VMEM, well
        # under the scoped limit on v5e/v6e/v7x, while amortizing the ~0.35 us
        # per-grid-step overhead and keeping >=2 blocks for v7x's two TCs when
        # N is large.
        row_tile = max(8, ((2 * 1024 * 1024) // (t_pad * itemsize)) // 8 * 8)
    row_tile = min(row_tile, n)

    scal = jnp.array([size, from_index, to_index], dtype=jnp.int32)
    out = pl.pallas_call(
        _time_swap_kernel,
        out_shape=jax.ShapeDtypeStruct((n, t_pad), xp.dtype),
        grid_spec=pltpu.PrefetchScalarGridSpec(
            num_scalar_prefetch=1,
            grid=(pl.cdiv(n, row_tile),),
            in_specs=[pl.BlockSpec((row_tile, t_pad), lambda i, s: (i, 0))],
            out_specs=pl.BlockSpec((row_tile, t_pad), lambda i, s: (i, 0)),
        ),
        compiler_params=pltpu.CompilerParams(
            dimension_semantics=("parallel",),
            vmem_limit_bytes=32 * 1024 * 1024,
        ),
    )(scal, xp)
    return out if t_pad == t else out[:, :t]


def random_time_swap(x, min_size_ratio, max_size_ratio, p, rng):
    """JAX/Pallas port of RandomTimeSwap.forward.

    Host-side RNG picks the segment (mirroring the PyTorch module's `random`);
    the swap runs in the Pallas kernel. When the augmentation is not applied
    (or size == 0), the input is returned as-is with no kernel launch.
    """
    _, t = x.shape
    if rng.random() < p:
        min_size = int(t * min_size_ratio)
        max_size = int(t * max_size_ratio)
        if max_size <= min_size:  # host-side edge case (tiny T / close ratios)
            max_size = min_size + 1
        size = rng.randrange(min_size, max_size)
        from_index = rng.randrange(0, max(t - size, 1))
        to_index = rng.randrange(0, max(t - size, 1))
    else:
        size, from_index, to_index = 0, 0, 0

    if size <= 0:
        return x, (size, from_index, to_index)  # identity: skip the kernel
    return time_swap(x, size, from_index, to_index), (size, from_index, to_index)


if __name__ == "__main__":
    def ref_swap(x_np, size, fi, ti):
        # Exact numpy mirror of the PyTorch module (second assignment wins).
        y = x_np.copy()
        if size > 0:
            y[:, fi:fi + size] = x_np[:, ti:ti + size]
            y[:, ti:ti + size] = x_np[:, fi:fi + size]
        return y

    # Case 1: explicit swaps on (16, 128), including an overlapping pair.
    x = jax.random.normal(jax.random.PRNGKey(0), (16, 128), dtype=jnp.float32)
    x_np = np.asarray(x)
    for (size, fi, ti) in [(32, 10, 70), (40, 20, 40), (17, 90, 3)]:
        y = jax.block_until_ready(time_swap(x, size, fi, ti))
        np.testing.assert_allclose(np.asarray(y), ref_swap(x_np, size, fi, ti),
                                   rtol=0, atol=0)

    # Case 2: time axis not a multiple of 128 (exercises the lane-padding path).
    x2 = jax.random.normal(jax.random.PRNGKey(1), (8, 200), dtype=jnp.float32)
    x2_np = np.asarray(x2)
    y2 = jax.block_until_ready(time_swap(x2, 30, 5, 150))
    np.testing.assert_allclose(np.asarray(y2), ref_swap(x2_np, 30, 5, 150),
                               rtol=0, atol=0)

    # Case 3: full module behaviour with host-side RNG.
    rng = random.Random(0)
    y3, (size, fi, ti) = random_time_swap(x, 0.05, 0.25, 1.0, rng)
    y3 = jax.block_until_ready(y3)
    np.testing.assert_allclose(np.asarray(y3), ref_swap(x_np, size, fi, ti),
                               rtol=0, atol=0)

    # Case 4: p = 0 short-circuits to the input without launching the kernel.
    y4, _ = random_time_swap(x, 0.05, 0.25, 0.0, rng)
    assert y4 is x

    print("KERNEL_OK")
</pallas_src>

<mosaic_0001>
module attributes {stable_mosaic.version = 11 : i64} {
  func.func @_time_swap_kernel(%arg0: i32, %arg1: memref<3xi32, #tpu.memory_space<smem>>, %arg2: memref<16x128xf32, #tpu.memory_space<vmem>>, %arg3: memref<16x128xf32, #tpu.memory_space<vmem>>) attributes {dimension_semantics = [#tpu.dimension_semantics<parallel>], iteration_bounds = array<i64: 1>, scalar_prefetch = 1 : i64, scratch_operands = 0 : i64, tpu.core_type = #tpu.core_type<tc>, window_params = [{transform_indices = @transform_0, window_bounds = array<i64: 16, 128>}, {transform_indices = @transform_1, window_bounds = array<i64: 16, 128>}]} {
    %c0 = arith.constant 0 : index
    %0 = memref.load %arg1[%c0] : memref<3xi32, #tpu.memory_space<smem>>
    %c1 = arith.constant 1 : index
    %1 = memref.load %arg1[%c1] : memref<3xi32, #tpu.memory_space<smem>>
    %c2 = arith.constant 2 : index
    %2 = memref.load %arg1[%c2] : memref<3xi32, #tpu.memory_space<smem>>
    %c0_0 = arith.constant 0 : index
    %c0_1 = arith.constant 0 : index
    %3 = vector.load %arg2[%c0_0, %c0_1] : memref<16x128xf32, #tpu.memory_space<vmem>>, vector<16x128xf32>
    %4 = tpu.iota {dimensions = array<i32: 1>} : vector<16x128xi32>
    %5 = vector.broadcast %1 : i32 to vector<16x128xi32>
    %6 = arith.cmpi sge, %4, %5 : vector<16x128xi32>
    %7 = arith.addi %1, %0 : i32
    %8 = vector.broadcast %7 : i32 to vector<16x128xi32>
    %9 = arith.cmpi slt, %4, %8 : vector<16x128xi32>
    %10 = arith.andi %6, %9 : vector<16x128xi1>
    %11 = vector.broadcast %2 : i32 to vector<16x128xi32>
    %12 = arith.cmpi sge, %4, %11 : vector<16x128xi32>
    %13 = arith.addi %2, %0 : i32
    %14 = vector.broadcast %13 : i32 to vector<16x128xi32>
    %15 = arith.cmpi slt, %4, %14 : vector<16x128xi32>
    %16 = arith.andi %12, %15 : vector<16x128xi1>
    %17 = arith.subi %2, %1 : i32
    %c0_i32 = arith.constant 0 : i32
    %18 = arith.cmpi sgt, %17, %c0_i32 : i32
    %c128_i32 = arith.constant 128 : i32
    %19 = arith.subi %c128_i32, %17 : i32
    %c0_i32_2 = arith.constant 0 : i32
    %20 = arith.subi %c0_i32_2, %17 : i32
    %21 = arith.select %18, %19, %20 : i32
    %c0_i32_3 = arith.constant 0 : i32
    %22 = arith.cmpi slt, %17, %c0_i32_3 : i32
    %c128_i32_4 = arith.constant 128 : i32
    %23 = arith.addi %c128_i32_4, %17 : i32
    %24 = arith.select %22, %23, %17 : i32
    %25 = tpu.dynamic_rotate %3 by %21 dim 1 : vector<16x128xf32>, i32 -> vector<16x128xf32>
    %26 = tpu.dynamic_rotate %3 by %24 dim 1 : vector<16x128xf32>, i32 -> vector<16x128xf32>
    %27 = arith.select %10, %25, %3 : vector<16x128xi1>, vector<16x128xf32>
    %28 = arith.select %16, %26, %27 : vector<16x128xi1>, vector<16x128xf32>
    %c0_5 = arith.constant 0 : index
    %c0_6 = arith.constant 0 : index
    %29 = vector.load %arg3[%c0_5, %c0_6] : memref<16x128xf32, #tpu.memory_space<vmem>>, vector<16x128xf32>
    tpu.vector_store %arg3[%c0_5, %c0_6], %28 {strides = array<i32>} : memref<16x128xf32, #tpu.memory_space<vmem>>, vector<16x128xf32>,
    return
  }
  func.func @transform_0(%arg0: i32, %arg1: memref<3xi32, #tpu.memory_space<smem>>) -> (i32, i32) {
    %c0_i32 = arith.constant 0 : i32
    %c0_i32_0 = arith.constant 0 : i32
    return %arg0, %c0_i32 : i32, i32
  }
  func.func @transform_1(%arg0: i32, %arg1: memref<3xi32, #tpu.memory_space<smem>>) -> (i32, i32) {
    %c0_i32 = arith.constant 0 : i32
    %c0_i32_0 = arith.constant 0 : i32
    return %arg0, %c0_i32 : i32, i32
  }
}

</mosaic_0001>

<bundles_post_ra>
// kernel: tpu_custom_call.1
= control target key start
LH: loop header
LB: loop body
LE: loop exit
PB: predicated region body
PF: predicated region fallthrough
CT: control target
= control target key end

     0   :  { %s227_s0 = inlined_call_operand.hbm [shape: s32[3], index: 0, kind: input, shape index: {}]   ;;  %s228_s1 = inlined_call_operand.hbm [shape: f32[16,128], index: 1, kind: input, shape index: {}]   ;;  %s229_s2 = inlined_call_operand.hbm [shape: f32[16,128], index: 2, kind: output, shape index: {}]  }
   0x1   :  { %s97_s11 = scalar_lea.hbm %s227_s0, 16 }
   0x2   :  { %p98_p0 = scmp.ne.s32.totalorder %s227_s0, %s97_s11  ;;  %p101_p1 = scmp.lt.u32.totalorder %s97_s11, %s227_s0 }
   0x4   :  { %p103_p2 = pnand %p101_p1, %p98_p0 }
   0x6   :  { %106 = shalt.err (!%p103_p2)  }
   0x7   :  { %s157_s16 = smov [#allocation3]  }
   0x8   :  { %8 = dma.hbm_to_smem %s227_s0, 16, %s157_s16, [#allocation2] }
   0x9   :  { %151 = dma.done.wait [#allocation2], 16 }
   0xa   :  { %152 = vsyncadd [#allocation2], 4294967280 }
   0xb   :  { %10 = sfence }
   0xc   :  { %11 = vsyncpa [#allocation5], 0 }
   0xd   :  { %12 = vsyncpa [#allocation6], 0  ;;  %s158_s19 = smov [#allocation4]   ;;  %s107_s23 = scalar_lea.hbm %s228_s1, 256 }
   0xe   :  { %s18_s20 = sshll.u32 %s158_s19, 4  ;;  %p108_p3 = scmp.ne.s32.totalorder %s228_s1, %s107_s23  ;;  %s19_s20 = int_to_ptr.vmem [resolvable:$true] %s18_s20 }
   0xf   :  { %p111_p4 = scmp.lt.u32.totalorder %s107_s23, %s228_s1 }
  0x11   :  { %p113_p5 = pnand %p111_p4, %p108_p3 }
  0x13   :  { %116 = shalt.err (!%p113_p5)
}
  0x14   :  { %s117_s0 = scalar_lea.vmem %s19_s20, 256  ;;  %p122_p7 = scmp.lt.s32.totalorder %s19_s20, %s19_s20 }
  0x15   :  { %p118_p6 = scmp.ne.s32.totalorder %s19_s20, %s117_s0  ;;  %p123_p8 = scmp.lt.s32.totalorder %s117_s0, %s117_s0 }
  0x17   :  { %p124_p9 = por %p123_p8, %p122_p7 }
  0x19   :  { %p125_p10 = pnand %p124_p9, %p118_p6 }
  0x1b   :  { %128 = shalt.err (!%p125_p10)
}
  0x1c   :  { %s159_s28 = smov 128   ;;  %s160_s29 = smov 8  }
  0x1d   :  { %24 = dma.hbm_to_vmem [thread:$0]  %s228_s1, 256, %s19_s20, [#allocation5], %s159_s28, %s159_s28, %s160_s29  }
  0x1e   :  { %153 = dma.done.wait [#allocation5], 256  }
  0x1f   :  { %154 = vsyncadd [#allocation5], 4294967040  ;;  %s90_s4 = sld [smem:[#allocation3 + $0x1]]  ;;  %s91_s5 = sld [smem:[#allocation3 + $0x2]]  ;;  %v31_v0 = vld [vmem:[#allocation4] sm:$0xff]  ;;  %v32_v1 = vld [vmem:[#allocation4 + $0x8] sm:$0xff]  ;;  %v33_v2 = vlaneseq }
  0x20   :  { %s28_s1 = sld [smem:[#allocation3]]  ;;  %s161_s14 = smov [#allocation7]  }
  0x21   :  { %v34_v3 = vand.u32 127, %v33_v2  ;;  %s78_s15 = sshll.u32 %s161_s14, 4  ;;  %s79_s15 = int_to_ptr.vmem [resolvable:$true] %s78_s15 }
  0x22   :  { %s129_s16 = scalar_lea.vmem %s79_s15, 256  ;;  %p134_p0 = scmp.lt.s32.totalorder %s79_s15, %s79_s15 }
  0x23   :  { %p130_p13 = scmp.ne.s32.totalorder %s79_s15, %s129_s16  ;;  %p135_p1 = scmp.lt.s32.totalorder %s129_s16, %s129_s16 }
  0x25   :  { %s47_s6 = ssub.s32 %s91_s5, %s90_s4  ;;  %v35_v4 = vstv %s90_s4  ;;  %v41_v6 = vstv %s91_s5  ;;  %p136_p2 = por %p135_p1, %p134_p0 }
  0x26   :  { %p48_p11 = scmp.gt.s32.totalorder %s47_s6, 0  ;;  %s49_s7 = ssub.s32 128, %s47_s6  ;;  %vm36_vm0 = vcmp.ge.s32.totalorder %v34_v3, %v35_v4  ;;  %vm42_vm3 = vcmp.ge.s32.totalorder %v34_v3, %v41_v6 }
  0x27   :  { %s50_s8 = ssub.s32 0, %s47_s6  ;;  %p52_p12 = scmp.lt.s32.totalorder %s47_s6, 0 }
  0x28   :  { %s233_s7 = smov (!%p48_p11, %s49_s7), %s50_s8  ;;  %s53_s9 = sadd.s32 128, %s47_s6 }
  0x29   :  { %s55_s10 = sand.u32 127, %s233_s7   ;;  %s235_s9 = smov (!%p52_p12, %s53_s9), %s47_s6 }
  0x2a   :  { %57 = vrot.lane.b32.xlu0 %v31_v0, %s55_s10  ;;  %s61_s11 = sand.u32 127, %s235_s9   ;;  %s37_s12 = sadd.s32 %s90_s4, %s28_s1 }
  0x2b   :  { %63 = vrot.lane.b32.xlu1 %v31_v0, %s61_s11  ;;  %v38_v5 = vstv %s37_s12  ;;  %s43_s13 = sadd.s32 %s91_s5, %s28_s1  ;;  %p137_p3 = pnand %p136_p2, %p130_p13 }
  0x2c   :  { %vm39_vm1 = vcmp.lt.s32.totalorder %v34_v3, %v38_v5  ;;  %v44_v7 = vstv %s43_s13 }
  0x2d   :  { %vm204_vm2 = vmand %vm36_vm0, %vm39_vm1  ;;  %vm45_vm4 = vcmp.lt.s32.totalorder %v34_v3, %v44_v7 }
  0x2e   :  { %59 = vrot.lane.b32.xlu0 %v32_v1, %s55_s10  ;;  %vm46_vm5 = vmand %vm42_vm3, %vm45_vm4 }
  0x2f   :  { %65 = vrot.lane.b32.xlu1 %v32_v1, %s61_s11 }
  0x9c   :  { %v58_v9 = vpop.permute.xlu0 %57 }
  0x9d   :  { %v67_v10 = vsel %vm204_vm2, %v58_v9, %v31_v0  ;;  %v64_v11 = vpop.permute.xlu1 %63 }
  0x9e   :  { %v69_v12 = vsel %vm46_vm5, %v64_v11, %v67_v10 }
  0x9f   :  { %71 = vst [vmem:[#allocation7] sm:$0xff] %v69_v12 }
  0xa0   :  { %v60_v13 = vpop.permute.xlu0 %59 }
  0xa1   :  { %v68_v14 = vsel %vm204_vm2, %v60_v13, %v32_v1  ;;  %v66_v15 = vpop.permute.xlu1 %65 }
  0xa2   :  { %v70_v16 = vsel %vm46_vm5, %v66_v15, %v68_v14 }
  0xa3   :  { %72 = vst [vmem:[#allocation7 + $0x8] sm:$0xff] %v70_v16 }
  0xa4   :  { %140 = shalt.err (!%p137_p3)
}
  0xa5   :  { %s141_s19 = scalar_lea.hbm %s229_s2, 256 }
  0xa6   :  { %p142_p4 = scmp.ne.s32.totalorder %s229_s2, %s141_s19  ;;  %p145_p5 = scmp.lt.u32.totalorder %s141_s19, %s229_s2 }
  0xa8   :  { %p147_p6 = pnand %p145_p5, %p142_p4 }
  0xaa   :  { %150 = shalt.err (!%p147_p6)
}
  0xab   :  { %84 = dma.vmem_to_hbm [thread:$0]  %s79_s15, 256, %s229_s2, [#allocation6], %s159_s28, %s159_s28, %s160_s29  }
  0xac   :  { %155 = dma.done.wait [#allocation6], 256  }
  0xad   :  { %156 = vsyncadd [#allocation6], 4294967040 }
  0xae   :  { %88 = vsyncpa [#allocation5], 1 }
  0xaf   :  { %89 = vsyncpa [#allocation6], 1 }

</bundles_post_ra>
